<compile_context>
chip_gen: v7x
topology: tpu7x:2x2x1
jax: 0.10.0
libtpu: 0.0.40
codegen_flags: <defaults>
</compile_context>

<pallas_src>
import jax
import jax.numpy as jnp
from jax.experimental import pallas as pl
from jax.experimental.pallas import tpu as pltpu
import numpy as np


_HALO_LANES = 128  # lane-aligned halo block (>= K-1); keeps all big scratch stores aligned


def _make_residual_block_kernel(K, T_TILE, n_time_tiles, mxu_dtype):
    """Per-(batch, time-tile) kernel for a fixed (static) kernel_size K."""

    def kernel(x_ref, wc_ref, bc_ref, w1_ref, b1_ref, res_ref, skip_ref, xext_ref):
        # x_ref    : (1, C, T_TILE)     current time tile of x (NCT)
        # wc_ref   : (K, C_out, C_in)   causal conv taps, wc[j] = w_causal[:, :, j]
        # bc_ref   : (C, 1)             causal conv bias
        # w1_ref   : (C_out, C_in)      1x1 conv weight
        # b1_ref   : (C, 1)             1x1 conv bias
        # res_ref  : (1, C, T_TILE)
        # skip_ref : (1, C, T_TILE)
        # xext_ref : (C, 128 + T_TILE) VMEM scratch.  Columns [128, 128+T_TILE)
        #            stage the current tile; columns [128-(K-1), 128) carry the
        #            previous tile's tail (the causal halo), zeros on tile 0.
        t = pl.program_id(1)
        x = x_ref[0]                                     # (C, T_TILE)
        f32 = jnp.float32

        if K > 1:
            @pl.when(t == 0)
            def _zero_halo():                            # causal left-pad of the sequence
                xext_ref[:, :_HALO_LANES] = jnp.zeros(
                    (x.shape[0], _HALO_LANES), dtype=xext_ref.dtype)
            # Stage the current tile at a lane-aligned offset (plain aligned vst pass).
            xext_ref[:, pl.ds(_HALO_LANES, T_TILE)] = x

        # Causal conv: K unrolled MXU dots with f32 accumulation.  Tap j pairs with
        # time shift d = K-1-j;  rhs_d[:, l] = x_global[:, l - d] (halo when l < d).
        acc = None
        for j in range(K):
            d = K - 1 - j
            if d == 0:
                rhs = x                                   # zero-shift tap = current tile
            else:
                rhs = xext_ref[:, pl.ds(_HALO_LANES - d, T_TILE)]
            part = jnp.dot(wc_ref[j].astype(mxu_dtype), rhs.astype(mxu_dtype),
                           preferred_element_type=f32)
            acc = part if acc is None else acc + part
        conv = acc + bc_ref[...].astype(f32)              # (C, T_TILE)

        # Gated activation.  sigmoid(v) = 0.5*(1 + tanh(v/2)) -> one EUP op each
        # (activations stay f32: v5e's VPU/EUP have no bf16).
        gated = jnp.tanh(conv) * (0.5 * (jnp.tanh(0.5 * conv) + 1.0))

        # 1x1 conv == channel matmul; `res` and `skip` share the same values.
        skip = jnp.dot(w1_ref[...].astype(mxu_dtype), gated.astype(mxu_dtype),
                       preferred_element_type=f32) + b1_ref[...].astype(f32)

        res_ref[0] = (skip + x.astype(f32)).astype(res_ref.dtype)
        skip_ref[0] = skip.astype(skip_ref.dtype)

        if K > 1 and n_time_tiles > 1:
            # Save this tile's tail for the next time tile of the SAME batch
            # (aligned 128-lane store; re-zeroed when the next batch starts at t==0).
            xext_ref[:, :_HALO_LANES] = x[:, T_TILE - _HALO_LANES:]

    return kernel


def _choose_time_tile(T, target=1024):
    """Largest lane-dense (multiple of 128) tile <= target that divides T.

    target=1024 keeps the per-step footprint well under v7x's 64 MiB VMEM for
    realistic channel counts while amortizing the ~0.35 us per-grid-step overhead.
    """
    if T <= target:
        return T
    for tile in range(target - target % 128, 127, -128):
        if T % tile == 0:
            return tile
    # TODO(synk): pad T to a multiple of 128 (and mask the tail tile) instead of
    # falling back to a single, possibly VMEM-busting tile.
    return T


def residual_block_pallas(x_nct, w_causal, b_causal, w_1x1, b_1x1,
                          kernel_size, dilation, *, t_tile=None,
                          mxu_dtype=jnp.float32):
    """x_nct: (B, C, T).  Weights in PyTorch Conv1d layout:
       w_causal (C_out, C_in, K), b_causal (C,), w_1x1 (C_out, C_in, 1), b_1x1 (C,)."""
    # TODO(synk): dilation > 1 makes the original PyTorch forward raise a shape
    # error (`res += input` mismatch), so it is not reproduced here.
    assert dilation == 1, "ResidualBlock.forward is only shape-consistent for dilation=1"
    B, C, T = x_nct.shape
    K = int(kernel_size)
    assert 1 <= K <= _HALO_LANES

    T_TILE = _choose_time_tile(T) if t_tile is None else int(t_tile)
    assert T % T_TILE == 0 and (T_TILE == T or T_TILE % 128 == 0)
    NT = T // T_TILE

    # Tiny one-off weight repacking (no transposes of x; NCT kept end-to-end).
    wc = jnp.transpose(w_causal, (2, 0, 1))            # (K, C_out, C_in), wc[j]=w[:,:,j]
    bc = b_causal[:, None]                             # (C, 1)
    w1 = w_1x1[:, :, 0]                                # (C_out, C_in)
    b1 = b_1x1[:, None]                                # (C, 1)

    # VMEM budget: double-buffered in/out tiles + staging scratch + temporaries.
    itemsize = jnp.dtype(x_nct.dtype).itemsize
    tile_bytes = C * T_TILE * max(itemsize, 4)
    est = (16 * tile_bytes
           + itemsize * C * (_HALO_LANES + T_TILE)
           + 8 * (K * C * C + C * C + 2 * C)
           + (4 << 20))
    vmem_limit = int(min(64 << 20, max(32 << 20, est)))   # v7x physical VMEM = 64 MiB

    cost = pl.CostEstimate(
        flops=2 * B * T * C * C * (K + 1) + 6 * B * T * C,
        transcendentals=2 * B * T * C,
        bytes_accessed=3 * B * C * T * itemsize + (K + 1) * C * C * itemsize,
    )

    kernel = _make_residual_block_kernel(K, T_TILE, NT, mxu_dtype)

    res, skip = pl.pallas_call(
        kernel,
        out_shape=(jax.ShapeDtypeStruct((B, C, T), x_nct.dtype),
                   jax.ShapeDtypeStruct((B, C, T), x_nct.dtype)),
        grid_spec=pltpu.PrefetchScalarGridSpec(
            num_scalar_prefetch=0,
            grid=(B, NT),
            in_specs=[
                pl.BlockSpec((1, C, T_TILE), lambda b, t: (b, 0, t)),   # x tile
                pl.BlockSpec((K, C, C), lambda b, t: (0, 0, 0)),        # causal taps
                pl.BlockSpec((C, 1), lambda b, t: (0, 0)),              # causal bias
                pl.BlockSpec((C, C), lambda b, t: (0, 0)),              # 1x1 weight
                pl.BlockSpec((C, 1), lambda b, t: (0, 0)),              # 1x1 bias
            ],
            out_specs=[
                pl.BlockSpec((1, C, T_TILE), lambda b, t: (b, 0, t)),
                pl.BlockSpec((1, C, T_TILE), lambda b, t: (b, 0, t)),
            ],
            scratch_shapes=[
                pltpu.VMEM((C, _HALO_LANES + T_TILE), x_nct.dtype),     # halo + stage
            ],
        ),
        compiler_params=pltpu.CompilerParams(
            # Batch axis may shard across v7x's two TensorCores; the time axis
            # carries the causal halo in scratch, so it stays sequential per core.
            dimension_semantics=("parallel", "arbitrary"),
            vmem_limit_bytes=vmem_limit,
        ),
        cost_estimate=cost,
    )(x_nct, wc, bc, w1, b1)

    return res, skip


def residual_block_reference(x_nct, w_causal, b_causal, w_1x1, b_1x1,
                             kernel_size, dilation):
    """Pure-JAX replica of the PyTorch module for verification."""
    K = kernel_size
    x_pad = jnp.pad(x_nct, ((0, 0), (0, 0), (K - 1, K - 1)))       # Conv1d padding=K-1
    conv = jax.lax.conv_general_dilated(
        x_pad, w_causal, window_strides=(1,), padding="VALID",
        rhs_dilation=(dilation,),
        dimension_numbers=("NCH", "OIH", "NCH")) + b_causal[None, :, None]
    if K > 1:
        conv = conv[:, :, :-(K - 1)]                               # CausalConv1d slice
    gated = jnp.tanh(conv) * jax.nn.sigmoid(conv)
    skip = jax.lax.conv_general_dilated(
        gated, w_1x1, window_strides=(1,), padding="VALID",
        dimension_numbers=("NCH", "OIH", "NCH")) + b_1x1[None, :, None]
    res = skip + x_nct
    return res, skip


if __name__ == "__main__":
    # Small shapes consistent with ResidualBlock(num_filters=16, kernel_size=2, dilation=1).
    B, C, T = 2, 16, 256
    kernel_size, dilation = 2, 1

    key = jax.random.PRNGKey(0)
    kx, k1, k2, k3, k4 = jax.random.split(key, 5)

    x = jax.random.normal(kx, (B, C, T), dtype=jnp.float32)

    # Deterministic parameter init (PyTorch Conv1d-style uniform bounds).
    bound_c = 1.0 / np.sqrt(C * kernel_size)
    w_causal = jax.random.uniform(k1, (C, C, kernel_size), jnp.float32,
                                  -bound_c, bound_c)
    b_causal = jax.random.uniform(k2, (C,), jnp.float32, -bound_c, bound_c)
    bound_1 = 1.0 / np.sqrt(C * 1)
    w_1x1 = jax.random.uniform(k3, (C, C, 1), jnp.float32, -bound_1, bound_1)
    b_1x1 = jax.random.uniform(k4, (C,), jnp.float32, -bound_1, bound_1)

    res_ref, skip_ref = residual_block_reference(x, w_causal, b_causal,
                                                 w_1x1, b_1x1,
                                                 kernel_size, dilation)

    # (a) Time-tiled path: T_TILE=128 -> 2 time tiles per batch, exercises the
    #     causal-halo carry across tiles with lane-dense (128) output stores.
    res_a, skip_a = residual_block_pallas(x, w_causal, b_causal, w_1x1, b_1x1,
                                          kernel_size, dilation, t_tile=128)
    jax.block_until_ready((res_a, skip_a))
    np.testing.assert_allclose(np.asarray(res_a), np.asarray(res_ref),
                               rtol=1e-5, atol=1e-5)
    np.testing.assert_allclose(np.asarray(skip_a), np.asarray(skip_ref),
                               rtol=1e-5, atol=1e-5)

    # (b) Default tiling (whole T fits in one tile here).
    res_b, skip_b = residual_block_pallas(x, w_causal, b_causal, w_1x1, b_1x1,
                                          kernel_size, dilation)
    jax.block_until_ready((res_b, skip_b))
    np.testing.assert_allclose(np.asarray(res_b), np.asarray(res_ref),
                               rtol=1e-5, atol=1e-5)
    np.testing.assert_allclose(np.asarray(skip_b), np.asarray(skip_ref),
                               rtol=1e-5, atol=1e-5)

    print("KERNEL_OK")
</pallas_src>

<mosaic_0001>
module attributes {stable_mosaic.version = 11 : i64} {
  func.func @kernel(%arg0: i32, %arg1: i32, %arg2: memref<1x16x128xf32, #tpu.memory_space<vmem>>, %arg3: memref<2x16x16xf32, #tpu.memory_space<vmem>>, %arg4: memref<16x1xf32, #tpu.memory_space<vmem>>, %arg5: memref<16x16xf32, #tpu.memory_space<vmem>>, %arg6: memref<16x1xf32, #tpu.memory_space<vmem>>, %arg7: memref<1x16x128xf32, #tpu.memory_space<vmem>>, %arg8: memref<1x16x128xf32, #tpu.memory_space<vmem>>, %arg9: memref<16x256xf32, #tpu.memory_space<vmem>>) attributes {dimension_semantics = [#tpu.dimension_semantics<parallel>, #tpu.dimension_semantics<arbitrary>], iteration_bounds = array<i64: 2, 2>, scalar_prefetch = 0 : i64, scratch_operands = 1 : i64, tpu.core_type = #tpu.core_type<tc>, window_params = [{transform_indices = @transform_0, window_bounds = array<i64: 1, 16, 128>}, {pipeline_mode = #tpu.pipeline_mode<synchronous>, transform_indices = @transform_1, window_bounds = array<i64: 2, 16, 16>}, {pipeline_mode = #tpu.pipeline_mode<synchronous>, transform_indices = @transform_2, window_bounds = array<i64: 16, 1>}, {pipeline_mode = #tpu.pipeline_mode<synchronous>, transform_indices = @transform_3, window_bounds = array<i64: 16, 16>}, {pipeline_mode = #tpu.pipeline_mode<synchronous>, transform_indices = @transform_4, window_bounds = array<i64: 16, 1>}, {transform_indices = @transform_5, window_bounds = array<i64: 1, 16, 128>}, {transform_indices = @transform_6, window_bounds = array<i64: 1, 16, 128>}]} {
    %c0 = arith.constant 0 : index
    %c0_0 = arith.constant 0 : index
    %c0_1 = arith.constant 0 : index
    %0 = vector.load %arg2[%c0, %c0_0, %c0_1] : memref<1x16x128xf32, #tpu.memory_space<vmem>>, vector<1x16x128xf32>
    %1 = vector.shape_cast %0 : vector<1x16x128xf32> to vector<16x128xf32>
    %c0_i32 = arith.constant 0 : i32
    %2 = arith.cmpi eq, %arg1, %c0_i32 : i32
    %3 = arith.extui %2 : i1 to i32
    %c0_i32_2 = arith.constant 0 : i32
    %4 = arith.cmpi ne, %3, %c0_i32_2 : i32
    scf.if %4 {
      %cst_29 = arith.constant 0.000000e+00 : f32
      %39 = vector.broadcast %cst_29 : f32 to vector<16x128xf32>
      %c0_30 = arith.constant 0 : index
      %c0_31 = arith.constant 0 : index
      %40 = vector.load %arg9[%c0_30, %c0_31] : memref<16x256xf32, #tpu.memory_space<vmem>>, vector<16x128xf32>
      tpu.vector_store %arg9[%c0_30, %c0_31], %39 {strides = array<i32>} : memref<16x256xf32, #tpu.memory_space<vmem>>, vector<16x128xf32>,
    } else {
    }
    %c0_3 = arith.constant 0 : index
    %c128 = arith.constant 128 : index
    %5 = vector.load %arg9[%c0_3, %c128] : memref<16x256xf32, #tpu.memory_space<vmem>>, vector<16x128xf32>
    tpu.vector_store %arg9[%c0_3, %c128], %1 {strides = array<i32>} : memref<16x256xf32, #tpu.memory_space<vmem>>, vector<16x128xf32>,
    %c0_4 = arith.constant 0 : index
    %c127 = arith.constant 127 : index
    %6 = vector.load %arg9[%c0_4, %c127] : memref<16x256xf32, #tpu.memory_space<vmem>>, vector<16x128xf32>
    %c0_5 = arith.constant 0 : index
    %c0_6 = arith.constant 0 : index
    %c0_7 = arith.constant 0 : index
    %7 = vector.load %arg3[%c0_5, %c0_6, %c0_7] : memref<2x16x16xf32, #tpu.memory_space<vmem>>, vector<1x16x16xf32>
    %8 = vector.shape_cast %7 : vector<1x16x16xf32> to vector<16x16xf32>
    %cst = arith.constant dense<0.000000e+00> : vector<16x128xf32>
    %9 = tpu.matmul %8, %6, %cst {dimension_numbers = #tpu.dot_dimension_numbers<[1], [0], [0], [1], [0, 0, 1, 1], [], []>} : vector<16x16xf32>, vector<16x128xf32>, vector<16x128xf32> -> vector<16x128xf32>
    %c1 = arith.constant 1 : index
    %c0_8 = arith.constant 0 : index
    %c0_9 = arith.constant 0 : index
    %10 = vector.load %arg3[%c1, %c0_8, %c0_9] : memref<2x16x16xf32, #tpu.memory_space<vmem>>, vector<1x16x16xf32>
    %11 = vector.shape_cast %10 : vector<1x16x16xf32> to vector<16x16xf32>
    %cst_10 = arith.constant dense<0.000000e+00> : vector<16x128xf32>
    %12 = tpu.matmul %11, %1, %cst_10 {dimension_numbers = #tpu.dot_dimension_numbers<[1], [0], [0], [1], [0, 0, 1, 1], [], []>} : vector<16x16xf32>, vector<16x128xf32>, vector<16x128xf32> -> vector<16x128xf32>
    %13 = arith.addf %9, %12 : vector<16x128xf32>
    %c0_11 = arith.constant 0 : index
    %c0_12 = arith.constant 0 : index
    %14 = vector.load %arg4[%c0_11, %c0_12] : memref<16x1xf32, #tpu.memory_space<vmem>>, vector<16x1xf32>
    %15 = vector.broadcast %14 : vector<16x1xf32> to vector<16x128xf32>
    %16 = arith.addf %13, %15 : vector<16x128xf32>
    %17 = math.tanh %16 : vector<16x128xf32>
    %cst_13 = arith.constant 5.000000e-01 : f32
    %18 = vector.broadcast %cst_13 : f32 to vector<16x128xf32>
    %19 = arith.mulf %18, %16 : vector<16x128xf32>
    %20 = math.tanh %19 : vector<16x128xf32>
    %cst_14 = arith.constant 1.000000e+00 : f32
    %21 = vector.broadcast %cst_14 : f32 to vector<16x128xf32>
    %22 = arith.addf %20, %21 : vector<16x128xf32>
    %cst_15 = arith.constant 5.000000e-01 : f32
    %23 = vector.broadcast %cst_15 : f32 to vector<16x128xf32>
    %24 = arith.mulf %23, %22 : vector<16x128xf32>
    %25 = arith.mulf %17, %24 : vector<16x128xf32>
    %c0_16 = arith.constant 0 : index
    %c0_17 = arith.constant 0 : index
    %26 = vector.load %arg5[%c0_16, %c0_17] : memref<16x16xf32, #tpu.memory_space<vmem>>, vector<16x16xf32>
    %cst_18 = arith.constant dense<0.000000e+00> : vector<16x128xf32>
    %27 = tpu.matmul %26, %25, %cst_18 {dimension_numbers = #tpu.dot_dimension_numbers<[1], [0], [0], [1], [0, 0, 1, 1], [], []>} : vector<16x16xf32>, vector<16x128xf32>, vector<16x128xf32> -> vector<16x128xf32>
    %c0_19 = arith.constant 0 : index
    %c0_20 = arith.constant 0 : index
    %28 = vector.load %arg6[%c0_19, %c0_20] : memref<16x1xf32, #tpu.memory_space<vmem>>, vector<16x1xf32>
    %29 = vector.broadcast %28 : vector<16x1xf32> to vector<16x128xf32>
    %30 = arith.addf %27, %29 : vector<16x128xf32>
    %31 = arith.addf %30, %1 : vector<16x128xf32>
    %c0_21 = arith.constant 0 : index
    %c0_22 = arith.constant 0 : index
    %c0_23 = arith.constant 0 : index
    %32 = vector.load %arg7[%c0_21, %c0_22, %c0_23] : memref<1x16x128xf32, #tpu.memory_space<vmem>>, vector<1x16x128xf32>
    %33 = vector.shape_cast %32 : vector<1x16x128xf32> to vector<16x128xf32>
    %34 = vector.shape_cast %31 : vector<16x128xf32> to vector<1x16x128xf32>
    tpu.vector_store %arg7[%c0_21, %c0_22, %c0_23], %34 {strides = array<i32>} : memref<1x16x128xf32, #tpu.memory_space<vmem>>, vector<1x16x128xf32>,
    %c0_24 = arith.constant 0 : index
    %c0_25 = arith.constant 0 : index
    %c0_26 = arith.constant 0 : index
    %35 = vector.load %arg8[%c0_24, %c0_25, %c0_26] : memref<1x16x128xf32, #tpu.memory_space<vmem>>, vector<1x16x128xf32>
    %36 = vector.shape_cast %35 : vector<1x16x128xf32> to vector<16x128xf32>
    %37 = vector.shape_cast %30 : vector<16x128xf32> to vector<1x16x128xf32>
    tpu.vector_store %arg8[%c0_24, %c0_25, %c0_26], %37 {strides = array<i32>} : memref<1x16x128xf32, #tpu.memory_space<vmem>>, vector<1x16x128xf32>,
    %c0_27 = arith.constant 0 : index
    %c0_28 = arith.constant 0 : index
    %38 = vector.load %arg9[%c0_27, %c0_28] : memref<16x256xf32, #tpu.memory_space<vmem>>, vector<16x128xf32>
    tpu.vector_store %arg9[%c0_27, %c0_28], %1 {strides = array<i32>} : memref<16x256xf32, #tpu.memory_space<vmem>>, vector<16x128xf32>,
    return
  }
  func.func @transform_0(%arg0: i32, %arg1: i32) -> (i32, i32, i32) {
    %c0_i32 = arith.constant 0 : i32
    %c0_i32_0 = arith.constant 0 : i32
    return %arg0, %c0_i32, %arg1 : i32, i32, i32
  }
  func.func @transform_1(%arg0: i32, %arg1: i32) -> (i32, i32, i32) {
    %c0_i32 = arith.constant 0 : i32
    %c0_i32_0 = arith.constant 0 : i32
    %c0_i32_1 = arith.constant 0 : i32
    %c0_i32_2 = arith.constant 0 : i32
    return %c0_i32, %c0_i32_0, %c0_i32_1 : i32, i32, i32
  }
  func.func @transform_2(%arg0: i32, %arg1: i32) -> (i32, i32) {
    %c0_i32 = arith.constant 0 : i32
    %c0_i32_0 = arith.constant 0 : i32
    %c0_i32_1 = arith.constant 0 : i32
    return %c0_i32, %c0_i32_0 : i32, i32
  }
  func.func @transform_3(%arg0: i32, %arg1: i32) -> (i32, i32) {
    %c0_i32 = arith.constant 0 : i32
    %c0_i32_0 = arith.constant 0 : i32
    %c0_i32_1 = arith.constant 0 : i32
    return %c0_i32, %c0_i32_0 : i32, i32
  }
  func.func @transform_4(%arg0: i32, %arg1: i32) -> (i32, i32) {
    %c0_i32 = arith.constant 0 : i32
    %c0_i32_0 = arith.constant 0 : i32
    %c0_i32_1 = arith.constant 0 : i32
    return %c0_i32, %c0_i32_0 : i32, i32
  }
  func.func @transform_5(%arg0: i32, %arg1: i32) -> (i32, i32, i32) {
    %c0_i32 = arith.constant 0 : i32
    %c0_i32_0 = arith.constant 0 : i32
    return %arg0, %c0_i32, %arg1 : i32, i32, i32
  }
  func.func @transform_6(%arg0: i32, %arg1: i32) -> (i32, i32, i32) {
    %c0_i32 = arith.constant 0 : i32
    %c0_i32_0 = arith.constant 0 : i32
    return %arg0, %c0_i32, %arg1 : i32, i32, i32
  }
}

</mosaic_0001>

<bundles_post_ra>
// kernel: tpu_custom_call.1
= control target key start
LH: loop header
LB: loop body
LE: loop exit
PB: predicated region body
PF: predicated region fallthrough
CT: control target
= control target key end

     0   :  { %s1591_s0 = inlined_call_operand.hbm [shape: f32[2,16,256], index: 0, kind: input, shape index: {}]   ;;  %s1592_s1 = inlined_call_operand.vmem [shape: f32[2,16,16], index: 1, kind: input, shape index: {}]   ;;  %s1593_s2 = inlined_call_operand.vmem [shape: f32[16,1], index: 2, kind: input, shape index: {}]   ;;  %s1594_s3 = inlined_call_operand.hbm [shape: f32[16,16], index: 3, kind: input, shape index: {}]   ;;  %s1595_s4 = inlined_call_operand.vmem [shape: f32[16,1], index: 4, kind: input, shape index: {}]   ;;  %s1596_s5 = inlined_call_operand.hbm [shape: f32[2,16,256], index: 5, kind: output, shape index: {0}]   ;;  %s1597_s6 = inlined_call_operand.hbm [shape: f32[2,16,256], index: 6, kind: output, shape index: {1}]  }
   0x1   :  { %1611 = sst [smem:[#allocation19_spill]] %s1594_s3 }
   0x2   :  { %12 = vsyncpa [#allocation4], 0 }
   0x3   :  { %14 = vsyncpa [#allocation4 + $0x1], 0 }
   0x4   :  { %15 = vsyncpa [#allocation7], 0 }
   0x5   :  { %16 = vsyncpa [#allocation5], 0 }
   0x6   :  { %18 = vsyncpa [#allocation5 + $0x1], 0 }
   0x7   :  { %19 = vsyncpa [#allocation10], 0 }
   0x8   :  { %21 = vsyncpa [#allocation10 + $0x1], 0  ;;  %s1254_s21 = smov 0   ;;  %s1256_s22 = smov 0  }
   0x9   :  { %s1258_s23 = smov 0   ;;  %s1260_s24 = smov 0  }
   0xa   :  { %s1262_s25 = smov 0   ;;  %s1264_s26 = smov 0  }
   0xb   :  { %s1266_s27 = smov 0   ;;  %s1268_s28 = smov 0  }
   0xc LB: > { %1612 = sst [smem:[#allocation15_spill]] %s1176_s21  ;;  %s812_s29 = sadd.s32 4294967295, %s1204_s28   ;;  %s1204_s28 = sphi %s1268_s28, %s27_s28   ;;  %s1200_s27 = sphi %s1266_s27, %s1644_s27   ;;  %s1196_s26 = sphi %s1264_s26, %s1643_s26   ;;  %s1192_s25 = sphi %s1262_s25, %s1642_s25   ;;  %s1188_s24 = sphi %s1260_s24, %s1641_s24   ;;  %s1184_s23 = sphi %s1258_s23, %s1640_s23   ;;  %s1180_s22 = sphi %s1256_s22, %s1639_s22   ;;  %s1176_s21 = sphi %s1254_s21, %s1638_s21  }
   0xd   : > { %1613 = sst [smem:[#allocation16_spill]] %s1204_s28  ;;  %s813_s30 = sadd.s32 4294967294, %s1204_s28  }
   0xe   : > { %p55_p0 = scmp.ne.s32.totalorder %s1184_s23, %s1180_s22  ;;  %p56_p1 = scmp.eq.s32.totalorder %s1204_s28, 0 }
   0xf   : > { %p61_p2 = scmp.ne.s32.totalorder %s1180_s22, %s1176_s21  ;;  %p1302_p3 = scmp.eq.s32.totalorder %s812_s29, 0 }
  0x10   : > { %p171_p4 = scmp.eq.s32.totalorder %s812_s29, 3  ;;  %p1306_p5 = por %p56_p1, %p55_p0 }
  0x11   : > { %s1614_s8 = scalar_select %p1302_p3, 1, 0 }
  0x12   : > { %p177_p6 = scmp.eq.s32.totalorder %s813_s30, 3  ;;  %p1312_p7 = por %p1302_p3, %p61_p2 }
  0x13   : > { %p1316_p8 = por %p171_p4, %p55_p0  ;;  %p814_p10 = scmp.ge.s32.totalorder %s1204_s28, 1 }
  0x14   : > { %s1616_s10 = scalar_select %p1312_p7, 1, 0 }
  0x15   : > { %s1617_s11 = scalar_select %p1316_p8, 1, 0 }
  0x16   : > { %p1320_p9 = por %p177_p6, %p61_p2  ;;  %p212_p11 = scmp.lt.s32.totalorder %s1204_s28, 5 }
  0x17   : > { %s1206_s14 = smov [#allocation6]   ;;  %p915_p0 = scmp.lt.s32.totalorder %s1204_s28, 4 }
  0x18   : > { %s1618_s12 = scalar_select %p1320_p9, 1, 0 }
  0x19   : > { %p1326_p12 = pnand %p814_p10, %p212_p11  ;;  %s230_s15 = sshll.u32 %s1206_s14, 4  ;;  %s231_s15 = int_to_ptr.vmem [resolvable:$true] %s230_s15 }
  0x1a   : > { %1619 = sst [smem:[#allocation17_spill]] %s1618_s12  ;;  %p1341_p2 = pnand %p915_p0, %p1306_p5 }
  0x1b   : > { %s1620_s13 = scalar_select %p1326_p12, 1, 0 }
  0x1c   : > { %p899_p13 = pneg %p1326_p12  ;;  %s1623_s3 = sld [smem:[#allocation19_spill]] }
  0x1d   : > { %s1622_s17 = scalar_select %p1341_p2, 1, 0 }
  0x1e   : > { %p1335_p1 = pnand %p899_p13, %p1302_p3 }
  0x20   : > { %p1014_p6 = pneg %p1335_p1 }
  0x22   : > { %s1012_s20 = scalar_lea.hbm %s1623_s3, 256 }
  0x23   : > { %p1013_p4 = scmp.ne.s32.totalorder %s1623_s3, %s1012_s20  ;;  %p1019_p13 = scmp.lt.u32.totalorder %s1012_s20, %s1623_s3 }
  0x25   : > { %p1015_p10 = pnand %p1014_p6, %p1013_p4 }
  0x27   : > { %p1016_p11 = pneg %p1015_p10 }
  0x29   : > { %p1021_p5 = pnand %p1019_p13, %p1016_p11 }
  0x2b   : > { %1024 = shalt.err (!%p1021_p5)
}
  0x2c   : > { %s1025_s9 = scalar_lea.vmem %s231_s15, 256  ;;  %p1033_p3 = scmp.lt.s32.totalorder %s231_s15, %s231_s15 }
  0x2d   : > { %p1026_p0 = scmp.ne.s32.totalorder %s231_s15, %s1025_s9  ;;  %p1034_p7 = scmp.lt.s32.totalorder %s1025_s9, %s1025_s9 }
  0x2f   : > { %p1028_p9 = pnand %p1026_p0, %p1014_p6  ;;  %p1035_p12 = por %p1034_p7, %p1033_p3 }
  0x31   : > { %p1029_p8 = pneg %p1028_p9 }
  0x33   : > { %p1036_p2 = pnand %p1035_p12, %p1029_p8 }
  0x35   : > { %1039 = shalt.err (!%p1036_p2)
}
  0x36   : > { %s1606_s18 = smov 128   ;;  %s1607_s7 = smov 8  }
  0x37   : > { %902 = dma.hbm_to_vmem [thread:$0]  (!%p1335_p1), %s1623_s3, 256, %s231_s15, [#allocation7], %s1606_s18, %s1606_s18, %s1607_s7  }
  0x38   : > { %s36_s29 = sadd.s32 1, %s1196_s26  ;;  %s39_s30 = sadd.s32 1, %s1200_s27 }
  0x39   : > { %p37_p3 = scmp.ge.s32.totalorder %s36_s29, 2  ;;  %s247_s14 = sand.u32 1, %s1184_s23  }
  0x3a   : > { %s818_s9 = sshll.u32 %s1200_s27, 2  ;;  %s817_s16 = sshll.u32 %s247_s14, 4 }
  0x3b   : > { %s1646_s29 = smov (%p37_p3, %s36_s29), 0  ;;  %s1648_s30 = smov (!%p37_p3, %s39_s30), %s1200_s27 }
  0x3c   : > { %1624 = sst [smem:[#allocation18_spill]] %s1646_s29  ;;  %s44_s12 = ssub.s32 %s1196_s26, %s1646_s29 }
  0x3d   : > { %p41_p7 = scmp.ge.s32.totalorder %s1648_s30, 2  ;;  %s256_s21 = sadd.s32 %s1196_s26, %s818_s9 }
  0x3e   : > { %s819_s15 = sshll.u32 %s256_s21, 7  ;;  %s251_s19 = scalar_lea.vmem [#allocation3], %s817_s16 }
  0x3f   : > { %s1650_s30 = smov (%p41_p7, %s1648_s30), 0  ;;  %s259_s20 = sshll.u32 %s251_s19, 4  ;;  %s1385_s20 = int_to_ptr.vmem [resolvable:$true] %s259_s20 }
  0x40   : > { %s43_s18 = ssub.s32 %s1200_s27, %s1650_s30  ;;  %s1381_s28 = scalar_lea.hbm %s1591_s0, %s819_s15 }
  0x41   : > { %s1383_s29 = sor.u32 %s44_s12, %s43_s18  ;;  %s1388_s9 = scalar_lea.sflag [#allocation4], %s247_s14 }
  0x42   : > { %p46_p8 = scmp.eq.s32.totalorder %s1383_s29, 0  ;;  %s1040_s21 = scalar_lea.hbm %s1381_s28, 256 }
  0x43   : > { %p1041_p9 = scmp.ne.s32.totalorder %s1381_s28, %s1040_s21  ;;  %p1625_p12 = scmp.ne.s32.totalorder %s1622_s17, 0 }
  0x44   : > { %s1045_s16 = scalar_lea.hbm %s1591_s0, 1024  ;;  %p1046_p6 = scmp.lt.u32.totalorder %s1381_s28, %s1591_s0 }
  0x45   : > { %p1042_p1 = pneg %p1625_p12  ;;  %p1047_p10 = scmp.lt.u32.totalorder %s1045_s16, %s1040_s21 }
  0x46   : > { %p1049_p13 = scmp.lt.u32.totalorder %s1040_s21, %s1381_s28 }
  0x47   : > { %p1043_p2 = pnand %p1042_p1, %p1041_p9  ;;  %p1048_p11 = por %p1047_p10, %p1046_p6 }
  0x49   : > { %p1044_p4 = pneg %p1043_p2  ;;  %p1050_p5 = por %p1049_p13, %p1048_p11 }
  0x4b   : > { %p1051_p0 = pnand %p1050_p5, %p1044_p4 }
  0x4d   : > { %1054 = shalt.err (!%p1051_p0)
}
  0x4e   : > { %s1055_s14 = scalar_lea.vmem %s1385_s20, 256  ;;  %s1209_s15 = smov [#allocation3]  }
  0x4f   : > { %p1056_p3 = scmp.ne.s32.totalorder %s1385_s20, %s1055_s14  ;;  %s1060_s19 = sshll.u32 %s1209_s15, 4  ;;  %s1061_s19 = int_to_ptr.vmem [resolvable:$false] %s1060_s19 }
  0x50   : > { %s1062_s3 = scalar_lea.vmem %s1061_s19, 512  ;;  %p1063_p2 = scmp.lt.s32.totalorder %s1385_s20, %s1061_s19 }
  0x51   : > { %p1058_p7 = pnand %p1056_p3, %p1042_p1  ;;  %p1064_p6 = scmp.lt.s32.totalorder %s1062_s3, %s1055_s14 }
  0x53   : > { %p1059_p9 = pneg %p1058_p7  ;;  %p1065_p10 = por %p1064_p6, %p1063_p2 }
  0x55   : > { %p1066_p11 = pnand %p1065_p10, %p1059_p9 }
  0x57   : > { %1069 = shalt.err (!%p1066_p11)
}
  0x58   : > { %s1210_s21 = smov 256   ;;  %s1626_s7 = smov 8  }
  0x59   : > { %s1627_s16 = smov 128   ;;  %s1628_s12 = sadd.s32 1, %s1184_s23 }
  0x5a   : > { %906 = dma.hbm_to_vmem [thread:$0]  (!%p1625_p12), %s1381_s28, 256, %s1385_s20, %s1388_s9, %s1210_s21, %s1627_s16, %s1626_s7  }
  0x5b   : > { %s1423_s18 = scalar_select %p46_p8, %s1184_s23, %s1628_s12  }
  0x5c   : > { %p1629_p1 = scmp.ne.s32.totalorder %s1620_s13, 0 }
  0x5d   : > { %s1428_s14 = sand.u32 (!%p1629_p1), 1, %s1180_s22   ;;  %p1630_p4 = scmp.ne.s32.totalorder (!%p1629_p1), %s1616_s10, 0 }
  0x5e   : > { %271 = sbr.rel (%p1629_p1) target bundleno = 740 (0x2e4), region = 40  ;;  %s821_s17 = sshll.u32 (!%p1629_p1), %s1428_s14, 4 }
  0x5f   : > { %s274_s15 = scalar_lea.sflag (!%p1629_p1), [#allocation4], %s1428_s14  ;;  %s277_s19 = scalar_lea.vmem (!%p1629_p1), [#allocation3], %s821_s17 }
  0x65   : > { %1159 = dma.done.wait (%p1630_p4), %s274_s15, 256  }
  0x66   : > { %1161 = vsyncadd (%p1630_p4), %s274_s15, 4294967040  ;;  %p1631_p8 = scmp.ne.s32.totalorder %s1614_s8, 0 }
  0x68   : > { %1163 = dma.done.wait (%p1631_p8), [#allocation7], 256  }
  0x69   : > { %1165 = vsyncadd (%p1631_p8), [#allocation7], 4294967040  ;;  %v1440_v0 = vld [vmem:[%s277_s19] sm:$0xff]  ;;  %v1442_v1 = vld [vmem:[%s277_s19 + $0x8] sm:$0xff]  ;;  %s1444_s28 = scalar_lea.vmem [#allocation8], %s821_s17  ;;  %s1446_s13 = scalar_lea.vmem [#allocation9], %s821_s17 }
  0x6a   : > { %p825_p12 = scmp.ne.s32.totalorder %s1188_s24, 0 }
  0x6b   : > { %v1211_v2 = vmov (!%p825_p12), 0.0  }
  0x6c   : > { %320 = sbr.rel (%p825_p12) target bundleno = 115 (0x73), region = 52  ;;  %321 = vst [vmem:[#allocation2] sm:$0xff] (!%p825_p12), %v1211_v2  ;;  %322 = vst [vmem:[#allocation2 + $0x10] sm:$0xff] (!%p825_p12), %v1211_v2 }
  0x73 PF: > { %v325_v3 = vld [vmem:[#allocation2] sm:$0xff]  ;;  %v327_v4 = vld [vmem:[#allocation2 + $0x10] sm:$0xff]  ;;  %v875_v5 = vpack.c.bf16 %v1442_v1, %v1440_v0  ;;  %vm334_vm0 = vcmask 130048   ;;  %s1212_s29 = smov 1   ;;  %v827_v9 = vld [vmem:[%s1592_s1 + $0x18] sm:$0xff]  ;;  %v1213_v12 = vmov 0  }
  0x74   : > { %v826_v6 = vld [vmem:[%s1592_s1 + $0x10] sm:$0xff]  ;;  %641 = vst [vmem:[#allocation2] sm:$0xff] %v1440_v0  ;;  %v992_v7 = vpack.i.bf16 %v1440_v0, %v325_v3  ;;  %642 = vst [vmem:[#allocation2 + $0x10] sm:$0xff] %v1442_v1  ;;  %v997_v8 = vpack.i.bf16 %v1442_v1, %v327_v4  ;;  %v514_v10 = vld [vmem:[%s1593_s2] sm:$0xff]  ;;  %1002 = vset.pattern.permute.xlu1 %v1213_v12  ;;  %1003 = vset.pattern.permute.xlu0 %v1213_v12  ;;  %vm428_vm1 = vcmask 7168   ;;  %s836_s9 = sshll.u32 %s1192_s25, 2 }
  0x75   : > { %858 = vmatprep.mubr.msk.f32.mxu0 %vm334_vm0, %v826_v6  ;;  %876 = vmatprep.subr.bf16.mxu0 %v875_v5  ;;  %v329_v11 = vld [vmem:[%s1592_s1] sm:$0xff]  ;;  %v515_v13 = vld [vmem:[%s1593_s2 + $0x8] sm:$0xff]  ;;  %s660_s3 = sadd.s32 %s1188_s24, %s836_s9  ;;  %s663_s7 = sshll.u32 %s1444_s28, 4  ;;  %s1505_s7 = int_to_ptr.vmem [resolvable:$true] %s663_s7 }
  0x76   : > { %993 = vrot.lane.b32.xlu0 %v992_v7, %s1212_s29  ;;  %878 = vmatpush3.bf16.msra.mxu0 %v875_v5  ;;  %v543_v14 = vld [vmem:[%s1595_s4 + $0x8] sm:$0xff]  ;;  %v540_v25 = vld [vmem:[#allocation6] sm:$0xff]  ;;  %s837_s21 = sshll.u32 %s660_s3, 7  ;;  %s680_s16 = sshll.u32 %s1446_s13, 4  ;;  %s1494_s16 = int_to_ptr.vmem [resolvable:$true] %s680_s16 }
  0x77   : > { %518 = vperm.xlu1 %1002, %v514_v10   ;;  %v330_v24 = vld [vmem:[%s1592_s1 + $0x8] sm:$0xff]  ;;  %872 = vmatprep.mubr.msk.f32.mxu1 %vm334_vm0, %v540_v25  ;;  %v542_v26 = vld [vmem:[%s1595_s4] sm:$0xff]  ;;  %s1492_s15 = scalar_lea.hbm %s1597_s6, %s837_s21  ;;  %s1503_s19 = scalar_lea.hbm %s1596_s5, %s837_s21 }
  0x78   : > { %v541_v46 = vld [vmem:[#allocation6 + $0x8] sm:$0xff]  ;;  %s649_s8 = scalar_lea.sflag [#allocation10], %s1428_s14  ;;  %s1070_s10 = scalar_lea.vmem %s1494_s16, 256 }
  0x79   : > { %859 = vmatmul.mubr.msk.f32.vlgmr.msra.gmra.mrb[0].mxu0 %vm334_vm0, %v827_v9  ;;  %p1071_p13 = scmp.ne.s32.totalorder %s1494_s16, %s1070_s10  ;;  %p1632_p5 = scmp.ne.s32.totalorder %s1617_s11, 0 }
  0x7a   : > { %998 = vrot.lane.b32.xlu0 %v997_v8, %s1212_s29  ;;  %865 = vmatprep.mubr.msk.f32.mxu0 %vm334_vm0, %v329_v11  ;;  %s1214_s29 = smov [#allocation9]  }
  0x7b   : > { %523 = vperm.xlu1 %1002, %v515_v13   ;;  %p1072_p0 = pnand %p1071_p13, %p1632_p5  ;;  %s1074_s20 = sshll.u32 %s1214_s29, 4  ;;  %s1075_s20 = int_to_ptr.vmem [resolvable:$false] %s1074_s20 }
  0x7c   : > { %s1076_s9 = scalar_lea.vmem %s1075_s20, 512  ;;  %p1077_p7 = scmp.lt.s32.totalorder %s1494_s16, %s1075_s20 }
  0x7d   : > { %p1073_p3 = pneg %p1072_p0  ;;  %p1078_p9 = scmp.lt.s32.totalorder %s1076_s9, %s1070_s10 }
  0x7e   : > { %546 = vperm.xlu0 %1003, %v542_v26  }
  0x7f   : > { %551 = vperm.xlu1 %1002, %v543_v14   ;;  %p1079_p2 = por %p1078_p9, %p1077_p7 }
  0x81   : > { %p1080_p6 = pnand %p1079_p2, %p1073_p3 }
  0xe8   : > { %v994_v15 = vpop.permute.xlu0 %993 }
  0xe9   : > { %v996_v16 = vunpack.i.h.bf16 %v994_v15  ;;  %v995_v17 = vunpack.i.l.bf16 %v994_v15 }
  0xeb   : > { %v429_v21 = vsel %vm428_vm1, %v995_v17, %v996_v16 }
  0xec   : > { %v999_v18 = vpop.permute.xlu0 %998 }
  0xed   : > { %v1001_v19 = vunpack.i.h.bf16 %v999_v18  ;;  %v1000_v20 = vunpack.i.l.bf16 %v999_v18 }
  0xef   : > { %v430_v22 = vsel %vm428_vm1, %v1000_v20, %v1001_v19 }
  0xf0   : > { %v879_v23 = vpack.c.bf16 %v430_v22, %v429_v21 }
  0xf2   : > { %880 = vmatprep.subr.bf16.mxu0 %v879_v23 }
  0xf3   : > { %882 = vmatpush3.bf16.msra.mxu0 %v879_v23 }
  0xf6   : > { %866 = vmatmul.mubr.msk.f32.vlgmr.msra.gmra.mrb[0].mxu0 %vm334_vm0, %v330_v24  ;;  %v519_v27 = vpop.permute.xlu1 %518 }
  0xfa   : > { %v524_v28 = vpop.permute.xlu1 %523 }
  0xfd   : > { %v547_v47 = vpop.permute.xlu0 %546 }
  0xfe   : > { %v552_v48 = vpop.permute.xlu1 %551 }
 0x1c9   : > { %v867_v29 = vpop.f32.mrb[0].mxu0 }
 0x1ca   : > { %v527_v30 = vadd.f32 %v867_v29, %v524_v28  ;;  %v505_v31 = vpop.f32.mrb[1].mxu0 }
 0x1cb   : > { %v526_v32 = vadd.f32 %v519_v27, %v505_v31 }
 0x1cc   : > { %v531_v33 = vmul.f32 0.5, %v527_v30 }
 0x1cd   : > { %v530_v34 = vmul.f32 0.5, %v526_v32 }
 0x1ce   : > { %1004 = vtanh.f32 %v531_v33 }
 0x1cf   : > { %1006 = vtanh.f32 %v530_v34 }
 0x1d0   : > { %1008 = vtanh.f32 %v527_v30 }
 0x1d1   : > { %1010 = vtanh.f32 %v526_v32 }
 0x1d8   : > { %v1005_v35 = vpop.eup %1004 }
 0x1d9   : > { %v1007_v36 = vpop.eup %1006  ;;  %v535_v37 = vadd.f32 1.0, %v1005_v35 }
 0x1da   : > { %v534_v38 = vadd.f32 1.0, %v1007_v36  ;;  %v1009_v40 = vpop.eup %1008 }
 0x1db   : > { %v537_v39 = vmul.f32 0.5, %v535_v37  ;;  %v1011_v42 = vpop.eup %1010 }
 0x1dc   : > { %v536_v41 = vmul.f32 0.5, %v534_v38 }
 0x1dd   : > { %v539_v43 = vmul.f32 %v1009_v40, %v537_v39 }
 0x1de   : > { %v538_v44 = vmul.f32 %v1011_v42, %v536_v41 }
 0x1e0   : > { %v883_v45 = vpack.c.bf16 %v539_v43, %v538_v44 }
 0x1e2   : > { %884 = vmatprep.subr.bf16.mxu1 %v883_v45 }
 0x1e3   : > { %886 = vmatpush3.bf16.msra.mxu1 %v883_v45 }
 0x1e6   : > { %873 = vmatmul.mubr.msk.f32.vlgmr.msra.gmra.mrb[0].mxu1 %vm334_vm0, %v541_v46 }
 0x2b9   : > { %v874_v49 = vpop.f32.mrb[0].mxu1 }
 0x2ba   : > { %v632_v50 = vadd.f32 %v874_v49, %v552_v48  ;;  %v626_v51 = vpop.f32.mrb[1].mxu1 }
 0x2bb   : > { %v627_v52 = vadd.f32 %v626_v51, %v547_v47 }
 0x2bc   : > { %v636_v53 = vadd.f32 %v632_v50, %v1442_v1  ;;  %640 = vst [vmem:[%s1446_s13 + $0x8] sm:$0xff] %v632_v50 }
 0x2bd   : > { %v635_v54 = vadd.f32 %v627_v52, %v1440_v0  ;;  %639 = vst [vmem:[%s1446_s13] sm:$0xff] %v627_v52 }
 0x2be   : > { %638 = vst [vmem:[%s1444_s28 + $0x8] sm:$0xff] %v636_v53 }
 0x2bf   : > { %1083 = shalt.err (!%p1080_p6)
}
 0x2c0   : > { %s1084_s13 = scalar_lea.hbm %s1492_s15, 256  ;;  %s1088_s12 = scalar_lea.hbm %s1597_s6, 1024 }
 0x2c1   : > { %p1085_p10 = scmp.ne.s32.totalorder %s1492_s15, %s1084_s13  ;;  %p1089_p4 = scmp.lt.u32.totalorder %s1492_s15, %s1597_s6 }
 0x2c2   : > { %p1090_p8 = scmp.lt.u32.totalorder %s1088_s12, %s1084_s13  ;;  %p1092_p13 = scmp.lt.u32.totalorder %s1084_s13, %s1492_s15 }
 0x2c3   : > { %p1086_p11 = pnand %p1085_p10, %p1632_p5 }
 0x2c4   : > { %p1091_p12 = por %p1090_p8, %p1089_p4 }
 0x2c5   : > { %p1087_p1 = pneg %p1086_p11 }
 0x2c6   : > { %p1093_p0 = por %p1092_p13, %p1091_p12 }
 0x2c8   : > { %p1094_p3 = pnand %p1093_p0, %p1087_p1 }
 0x2ca   : > { %1097 = shalt.err (!%p1094_p3)
}
 0x2cb   : > { %s1215_s25 = smov 128   ;;  %s1216_s10 = smov 256   ;;  %637 = vst [vmem:[%s1444_s28] sm:$0xff] %v635_v54 }
 0x2cc   : > { %s1217_s29 = smov 8   ;;  %s644_s20 = scalar_lea.sflag [#allocation5], %s1428_s14 }
 0x2cd   : > { %896 = dma.vmem_to_hbm [thread:$0]  (%p1632_p5), %s1494_s16, 256, %s1492_s15, %s649_s8, %s1215_s25, %s1216_s10, %s1217_s29  }
 0x2ce   : > { %s1098_s9 = scalar_lea.vmem %s1505_s7, 256  ;;  %s1218_s13 = smov [#allocation8]  }
 0x2cf   : > { %p1099_p7 = scmp.ne.s32.totalorder %s1505_s7, %s1098_s9  ;;  %s1102_s3 = sshll.u32 %s1218_s13, 4  ;;  %s1103_s3 = int_to_ptr.vmem [resolvable:$false] %s1102_s3 }
 0x2d0   : > { %s1104_s21 = scalar_lea.vmem %s1103_s3, 512  ;;  %p1105_p6 = scmp.lt.s32.totalorder %s1505_s7, %s1103_s3 }
 0x2d1   : > { %p1100_p9 = pnand %p1099_p7, %p1632_p5  ;;  %p1106_p10 = scmp.lt.s32.totalorder %s1104_s21, %s1098_s9 }
 0x2d3   : > { %p1101_p2 = pneg %p1100_p9  ;;  %p1107_p11 = por %p1106_p10, %p1105_p6 }
 0x2d5   : > { %p1108_p1 = pnand %p1107_p11, %p1101_p2 }
 0x2d7   : > { %1111 = shalt.err (!%p1108_p1)
}
 0x2d8   : > { %s1112_s28 = scalar_lea.hbm %s1503_s19, 256  ;;  %s1116_s8 = scalar_lea.hbm %s1596_s5, 1024 }
 0x2d9   : > { %p1113_p4 = scmp.ne.s32.totalorder %s1503_s19, %s1112_s28  ;;  %p1117_p13 = scmp.lt.u32.totalorder %s1503_s19, %s1596_s5 }
 0x2da   : > { %p1118_p0 = scmp.lt.u32.totalorder %s1116_s8, %s1112_s28  ;;  %p1120_p7 = scmp.lt.u32.totalorder %s1112_s28, %s1503_s19 }
 0x2db   : > { %p1114_p8 = pnand %p1113_p4, %p1632_p5 }
 0x2dc   : > { %p1119_p3 = por %p1118_p0, %p1117_p13 }
 0x2dd   : > { %p1115_p12 = pneg %p1114_p8 }
 0x2de   : > { %p1121_p9 = por %p1120_p7, %p1119_p3 }
 0x2e0   : > { %p1122_p2 = pnand %p1121_p9, %p1115_p12 }
 0x2e2   : > { %1125 = shalt.err (!%p1122_p2)
}
 0x2e3   : > { %895 = dma.vmem_to_hbm [thread:$0]  (%p1632_p5), %s1505_s7, 256, %s1503_s19, %s644_s20, %s1215_s25, %s1216_s10, %s1217_s29  }
 0x2e4 PF: > { %s1633_s24 = sld [smem:[#allocation16_spill]]  ;;  %s1634_s9 = sld [smem:[#allocation15_spill]] }
 0x2e5   : > { %s1635_s13 = sld [smem:[#allocation17_spill]] }
 0x2ea   : > { %p917_p6 = scmp.ge.s32.totalorder %s1633_s24, 2  ;;  %s695_s3 = sand.u32 1, %s1634_s9  }
 0x2eb   : > { %p1636_p10 = scmp.ne.s32.totalorder %s1635_s13, 0  ;;  %s696_s21 = scalar_lea.sflag [#allocation5], %s695_s3 }
 0x2ed   : > { %p908_p11 = pnand %p917_p6, %p1636_p10 }
 0x2ef   : > { %1167 = dma.done.wait (!%p908_p11), %s696_s21, 256  }
 0x2f0   : > { %1169 = vsyncadd (!%p908_p11), %s696_s21, 4294967040  ;;  %s705_s11 = scalar_lea.sflag [#allocation10], %s695_s3 }
 0x2f1   : > { %1171 = dma.done.wait (!%p908_p11), %s705_s11, 256  }
 0x2f2   : > { %1173 = vsyncadd (!%p908_p11), %s705_s11, 4294967040  ;;  %s27_s28 = sadd.s32 1, %s1633_s24   ;;  %s1637_s14 = sld [smem:[#allocation18_spill]] }
 0x2f3   : > { %p24_p1 = scmp.ge.s32.totalorder %s27_s28, 6   ;;  %s1638_s21 = smov %s1180_s22 }
 0x2f4   : > { %s1639_s22 = smov %s1184_s23  ;;  %s1640_s23 = smov %s1423_s18 }
 0x2f5   : > { %s1641_s24 = smov %s1196_s26  ;;  %s1642_s25 = smov %s1200_s27 }
 0x2f6   : > { %s1644_s27 = smov %s1650_s30  ;;  %26 = sbr.rel (!%p24_p1) target bundleno = 12 (0xc), region = 111 }
 0x2f8   : > { %s1643_s26 = smov %s1637_s14 }
 0x2fd   :  { %710 = vsyncpa [#allocation4], 1 }
 0x2fe   :  { %712 = vsyncpa [#allocation4 + $0x1], 1 }
 0x2ff   :  { %713 = vsyncpa [#allocation7], 1 }
 0x300   :  { %714 = vsyncpa [#allocation5], 1 }
 0x301   :  { %716 = vsyncpa [#allocation5 + $0x1], 1 }
 0x302   :  { %717 = vsyncpa [#allocation10], 1 }
 0x303   :  { %719 = vsyncpa [#allocation10 + $0x1], 1 }

</bundles_post_ra>
